<compile_context>
chip_gen: v7x
topology: tpu7x:2x2x1
jax: 0.10.0
libtpu: 0.0.40
codegen_flags: <defaults>
</compile_context>

<pallas_src>
import functools
import math

import jax
import jax.numpy as jnp
from jax import lax
from jax.experimental import pallas as pl
from jax.experimental.pallas import tpu as pltpu


# ----------------------------- fused Pallas kernel ---------------------------

def _mha_fused_kernel(xq_ref, xk_ref, xv_ref,
                      wq_ref, bq_ref, wk_ref, bk_ref, wv_ref, bv_ref,
                      wo_ref, bo_ref, o_ref, *, batch, seq, num_heads):
    """Single grid step == the whole (tiny) batch.

    xq/xk/xv_ref : (B*S, D) f32 activations
    w*_ref       : (D, D) bf16 weights, pre-transposed to (D_in, D_out)
                   (1/sqrt(d_k) already folded into wq)
    b*_ref       : (1, D) f32 biases (scale folded into bq)
    o_ref        : (B*S, D) f32 output
    """
    BS, D = xq_ref.shape
    B, S, H = batch, seq, num_heads
    dk = D // H

    def proj(x_ref, w_ref, b_ref):
        # bf16 MXU operands, f32 accumulation, f32 bias add.
        return jnp.dot(x_ref[...].astype(jnp.bfloat16), w_ref[...],
                       preferred_element_type=jnp.float32) + b_ref[...]

    q = proj(xq_ref, wq_ref, bq_ref)          # (B*S, D), already scaled
    k = proj(xk_ref, wk_ref, bk_ref)
    v = proj(xv_ref, wv_ref, bv_ref)

    # Split batch back out. Leading-dim reshape only (lane dim untouched, S==8
    # == sublane tile), so this is a no-op relayout.
    q3 = q.reshape(B, S, D)
    k3 = k.reshape(B, S, D)
    v3 = v.reshape(B, S, D)

    # Per-head scaled-dot-product attention, batched over B inside each dot.
    # Static unroll over H (H=4 toy size); see TODO(synk) header for scaling.
    head_ctx = []
    for h in range(H):
        sl = slice(h * dk, (h + 1) * dk)
        qh, kh, vh = q3[..., sl], k3[..., sl], v3[..., sl]          # (B, S, dk)

        # contract last dims of q and k -> no transpose emitted; f32 at dk=8.
        s = lax.dot_general(qh, kh, (((2,), (2,)), ((0,), (0,))),
                            preferred_element_type=jnp.float32)     # (B, S, S)

        # numerically-stable softmax along the key axis (all f32)
        m = jnp.max(s, axis=-1, keepdims=True)
        p = jnp.exp(s - m)
        p = p * pl.reciprocal(jnp.sum(p, axis=-1, keepdims=True), approx=True)

        head_ctx.append(
            lax.dot_general(p, vh, (((2,), (1,)), ((0,), (0,))),
                            preferred_element_type=jnp.float32))    # (B, S, dk)

    ctx = jnp.concatenate(head_ctx, axis=-1).reshape(BS, D)         # (B*S, D)

    out = jnp.dot(ctx.astype(jnp.bfloat16), wo_ref[...],
                  preferred_element_type=jnp.float32) + bo_ref[...]
    o_ref[...] = out.astype(o_ref.dtype)      # single full-block store


# --------------------------------- wrappers ----------------------------------

def pack_params(params, num_heads):
    """One-time setup: transpose PyTorch-layout [D_out, D_in] weights, fold the
    1/sqrt(d_k) attention scale into the query projection, store weights bf16."""
    D = params["wq"].shape[0]
    scale = 1.0 / math.sqrt(D // num_heads)

    def w_t(w, s=1.0):
        return (w.T * s).astype(jnp.bfloat16)

    def b_row(b, s=1.0):
        return (b * s).reshape(1, -1).astype(jnp.float32)

    return {
        "wq_t": w_t(params["wq"], scale), "bq": b_row(params["bq"], scale),
        "wk_t": w_t(params["wk"]),        "bk": b_row(params["bk"]),
        "wv_t": w_t(params["wv"]),        "bv": b_row(params["bv"]),
        "wo_t": w_t(params["wo"]),        "bo": b_row(params["bo"]),
    }


def multi_headed_attn(packed, query, key, value, num_heads):
    """query/key/value: (B, S, D) float32. Returns (B, S, D) float32."""
    B, S, D = query.shape
    kernel = functools.partial(_mha_fused_kernel,
                               batch=B, seq=S, num_heads=num_heads)

    # Flatten (B, S, D) -> (B*S, D) at the boundary (free XLA reshape): one
    # lane-dense 2-D slab per operand, single whole-array block, grid=() so
    # weights are resident exactly once (no multi-buffering).
    xq = query.reshape(B * S, D)
    xk = key.reshape(B * S, D)
    xv = value.reshape(B * S, D)

    vmem = pl.BlockSpec(memory_space=pltpu.MemorySpace.VMEM)

    out_flat = pl.pallas_call(
        kernel,
        out_shape=jax.ShapeDtypeStruct((B * S, D), jnp.float32),
        in_specs=[vmem] * 11,
        out_specs=vmem,
    )(xq, xk, xv,
      packed["wq_t"], packed["bq"],
      packed["wk_t"], packed["bk"],
      packed["wv_t"], packed["bv"],
      packed["wo_t"], packed["bo"])

    return out_flat.reshape(B, S, D)


# --------------------------------- reference ----------------------------------

def reference_mha(params, query, key, value, num_heads):
    B, S, D = query.shape
    H = num_heads
    dk = D // H

    def lin(x, w, b):
        return x @ w.T + b

    def split(x):
        return x.reshape(B, S, H, dk).transpose(0, 2, 1, 3)

    q = split(lin(query, params["wq"], params["bq"]))
    k = split(lin(key,   params["wk"], params["bk"]))
    v = split(lin(value, params["wv"], params["bv"]))
    s = jnp.einsum("bhqd,bhkd->bhqk", q, k) / math.sqrt(dk)
    p = jax.nn.softmax(s, axis=-1)
    ctx = jnp.einsum("bhqk,bhkd->bhqd", p, v)
    ctx = ctx.transpose(0, 2, 1, 3).reshape(B, S, D)
    return lin(ctx, params["wo"], params["bo"])


# ----------------------------------- main -------------------------------------

if __name__ == "__main__":
    B, S, D, H = 2, 8, 32, 4   # batch, seq, model_dim, num_heads  (d_k = 8)

    root = jax.random.PRNGKey(0)
    keys = jax.random.split(root, 12)
    bound = 1.0 / math.sqrt(D)

    def uni(k, shape):
        return jax.random.uniform(k, shape, jnp.float32, -bound, bound)

    params = {
        "wq": uni(keys[0], (D, D)), "bq": uni(keys[1], (D,)),
        "wk": uni(keys[2], (D, D)), "bk": uni(keys[3], (D,)),
        "wv": uni(keys[4], (D, D)), "bv": uni(keys[5], (D,)),
        "wo": uni(keys[6], (D, D)), "bo": uni(keys[7], (D,)),
    }

    query = jax.random.normal(keys[8],  (B, S, D), jnp.float32)
    key_x = jax.random.normal(keys[9],  (B, S, D), jnp.float32)
    value = jax.random.normal(keys[10], (B, S, D), jnp.float32)

    packed = jax.tree.map(jax.block_until_ready, pack_params(params, H))

    mha = jax.jit(functools.partial(multi_headed_attn, num_heads=H))
    out = jax.block_until_ready(mha(packed, query, key_x, value))

    ref = reference_mha(params, query, key_x, value, H)
    assert out.shape == (B, S, D)
    # Tolerance covers bf16 rounding of the projection-matmul operands (f32
    # accumulation kept) and the EUP approx-reciprocal in the softmax denom.
    max_err = jnp.max(jnp.abs(out - ref))
    assert jnp.allclose(out, ref, atol=2e-2, rtol=2e-2), (
        f"mismatch vs reference (max abs err = {max_err})")

    print("KERNEL_OK")
</pallas_src>

<mosaic_0001>
module attributes {stable_mosaic.version = 11 : i64} {
  func.func @_mha_fused_kernel(%arg0: memref<16x32xf32, #tpu.memory_space<vmem>>, %arg1: memref<16x32xf32, #tpu.memory_space<vmem>>, %arg2: memref<16x32xf32, #tpu.memory_space<vmem>>, %arg3: memref<32x32xbf16, #tpu.memory_space<vmem>>, %arg4: memref<1x32xf32, #tpu.memory_space<vmem>>, %arg5: memref<32x32xbf16, #tpu.memory_space<vmem>>, %arg6: memref<1x32xf32, #tpu.memory_space<vmem>>, %arg7: memref<32x32xbf16, #tpu.memory_space<vmem>>, %arg8: memref<1x32xf32, #tpu.memory_space<vmem>>, %arg9: memref<32x32xbf16, #tpu.memory_space<vmem>>, %arg10: memref<1x32xf32, #tpu.memory_space<vmem>>, %arg11: memref<16x32xf32, #tpu.memory_space<vmem>>) attributes {dimension_semantics = [], scalar_prefetch = 0 : i64, scratch_operands = 0 : i64, tpu.core_type = #tpu.core_type<tc>} {
    %c0 = arith.constant 0 : index
    %c0_0 = arith.constant 0 : index
    %0 = vector.load %arg0[%c0, %c0_0] : memref<16x32xf32, #tpu.memory_space<vmem>>, vector<16x32xf32>
    %1 = arith.truncf %0 : vector<16x32xf32> to vector<16x32xbf16>
    %c0_1 = arith.constant 0 : index
    %c0_2 = arith.constant 0 : index
    %2 = vector.load %arg3[%c0_1, %c0_2] : memref<32x32xbf16, #tpu.memory_space<vmem>>, vector<32x32xbf16>
    %cst = arith.constant dense<0.000000e+00> : vector<16x32xf32>
    %3 = tpu.matmul %1, %2, %cst {dimension_numbers = #tpu.dot_dimension_numbers<[1], [0], [0], [1], [0, 0, 1, 1], [], []>} : vector<16x32xbf16>, vector<32x32xbf16>, vector<16x32xf32> -> vector<16x32xf32>
    %c0_3 = arith.constant 0 : index
    %c0_4 = arith.constant 0 : index
    %4 = vector.load %arg4[%c0_3, %c0_4] : memref<1x32xf32, #tpu.memory_space<vmem>>, vector<1x32xf32>
    %5 = vector.broadcast %4 : vector<1x32xf32> to vector<16x32xf32>
    %6 = arith.addf %3, %5 : vector<16x32xf32>
    %c0_5 = arith.constant 0 : index
    %c0_6 = arith.constant 0 : index
    %7 = vector.load %arg1[%c0_5, %c0_6] : memref<16x32xf32, #tpu.memory_space<vmem>>, vector<16x32xf32>
    %8 = arith.truncf %7 : vector<16x32xf32> to vector<16x32xbf16>
    %c0_7 = arith.constant 0 : index
    %c0_8 = arith.constant 0 : index
    %9 = vector.load %arg5[%c0_7, %c0_8] : memref<32x32xbf16, #tpu.memory_space<vmem>>, vector<32x32xbf16>
    %cst_9 = arith.constant dense<0.000000e+00> : vector<16x32xf32>
    %10 = tpu.matmul %8, %9, %cst_9 {dimension_numbers = #tpu.dot_dimension_numbers<[1], [0], [0], [1], [0, 0, 1, 1], [], []>} : vector<16x32xbf16>, vector<32x32xbf16>, vector<16x32xf32> -> vector<16x32xf32>
    %c0_10 = arith.constant 0 : index
    %c0_11 = arith.constant 0 : index
    %11 = vector.load %arg6[%c0_10, %c0_11] : memref<1x32xf32, #tpu.memory_space<vmem>>, vector<1x32xf32>
    %12 = vector.broadcast %11 : vector<1x32xf32> to vector<16x32xf32>
    %13 = arith.addf %10, %12 : vector<16x32xf32>
    %c0_12 = arith.constant 0 : index
    %c0_13 = arith.constant 0 : index
    %14 = vector.load %arg2[%c0_12, %c0_13] : memref<16x32xf32, #tpu.memory_space<vmem>>, vector<16x32xf32>
    %15 = arith.truncf %14 : vector<16x32xf32> to vector<16x32xbf16>
    %c0_14 = arith.constant 0 : index
    %c0_15 = arith.constant 0 : index
    %16 = vector.load %arg7[%c0_14, %c0_15] : memref<32x32xbf16, #tpu.memory_space<vmem>>, vector<32x32xbf16>
    %cst_16 = arith.constant dense<0.000000e+00> : vector<16x32xf32>
    %17 = tpu.matmul %15, %16, %cst_16 {dimension_numbers = #tpu.dot_dimension_numbers<[1], [0], [0], [1], [0, 0, 1, 1], [], []>} : vector<16x32xbf16>, vector<32x32xbf16>, vector<16x32xf32> -> vector<16x32xf32>
    %c0_17 = arith.constant 0 : index
    %c0_18 = arith.constant 0 : index
    %18 = vector.load %arg8[%c0_17, %c0_18] : memref<1x32xf32, #tpu.memory_space<vmem>>, vector<1x32xf32>
    %19 = vector.broadcast %18 : vector<1x32xf32> to vector<16x32xf32>
    %20 = arith.addf %17, %19 : vector<16x32xf32>
    %21 = vector.shape_cast %6 : vector<16x32xf32> to vector<2x8x32xf32>
    %22 = vector.shape_cast %13 : vector<16x32xf32> to vector<2x8x32xf32>
    %23 = vector.shape_cast %20 : vector<16x32xf32> to vector<2x8x32xf32>
    %24 = vector.extract_strided_slice %21 {offsets = [0, 0, 0], sizes = [2, 8, 8], strides = [1, 1, 1]} : vector<2x8x32xf32> to vector<2x8x8xf32>
    %25 = vector.extract_strided_slice %22 {offsets = [0, 0, 0], sizes = [2, 8, 8], strides = [1, 1, 1]} : vector<2x8x32xf32> to vector<2x8x8xf32>
    %26 = vector.extract_strided_slice %23 {offsets = [0, 0, 0], sizes = [2, 8, 8], strides = [1, 1, 1]} : vector<2x8x32xf32> to vector<2x8x8xf32>
    %cst_19 = arith.constant dense<0.000000e+00> : vector<2x8x8xf32>
    %27 = tpu.matmul %24, %25, %cst_19 {dimension_numbers = #tpu.dot_dimension_numbers<[2], [2], [1], [1], [0, 0, 0, 1, 1, 1], [0], [0]>} : vector<2x8x8xf32>, vector<2x8x8xf32>, vector<2x8x8xf32> -> vector<2x8x8xf32>
    %cst_20 = arith.constant dense<0xFF800000> : vector<2x8xf32>
    %28 = vector.multi_reduction <maximumf>, %27, %cst_20 [2] : vector<2x8x8xf32> to vector<2x8xf32>
    %29 = vector.shape_cast %28 : vector<2x8xf32> to vector<2x8x1xf32>
    %30 = vector.broadcast %29 : vector<2x8x1xf32> to vector<2x8x8xf32>
    %31 = arith.subf %27, %30 : vector<2x8x8xf32>
    %32 = math.exp %31 : vector<2x8x8xf32>
    %cst_21 = arith.constant dense<0.000000e+00> : vector<2x8xf32>
    %33 = vector.multi_reduction <add>, %32, %cst_21 [2] : vector<2x8x8xf32> to vector<2x8xf32>
    %34 = vector.shape_cast %33 : vector<2x8xf32> to vector<2x8x1xf32>
    %35 = tpu.reciprocal %34 {approx = true} : vector<2x8x1xf32> -> vector<2x8x1xf32>
    %36 = vector.broadcast %35 : vector<2x8x1xf32> to vector<2x8x8xf32>
    %37 = arith.mulf %32, %36 : vector<2x8x8xf32>
    %cst_22 = arith.constant dense<0.000000e+00> : vector<2x8x8xf32>
    %38 = tpu.matmul %37, %26, %cst_22 {dimension_numbers = #tpu.dot_dimension_numbers<[2], [1], [1], [2], [0, 0, 0, 1, 1, 2], [0], [0]>} : vector<2x8x8xf32>, vector<2x8x8xf32>, vector<2x8x8xf32> -> vector<2x8x8xf32>
    %39 = vector.extract_strided_slice %21 {offsets = [0, 0, 8], sizes = [2, 8, 8], strides = [1, 1, 1]} : vector<2x8x32xf32> to vector<2x8x8xf32>
    %40 = vector.extract_strided_slice %22 {offsets = [0, 0, 8], sizes = [2, 8, 8], strides = [1, 1, 1]} : vector<2x8x32xf32> to vector<2x8x8xf32>
    %41 = vector.extract_strided_slice %23 {offsets = [0, 0, 8], sizes = [2, 8, 8], strides = [1, 1, 1]} : vector<2x8x32xf32> to vector<2x8x8xf32>
    %cst_23 = arith.constant dense<0.000000e+00> : vector<2x8x8xf32>
    %42 = tpu.matmul %39, %40, %cst_23 {dimension_numbers = #tpu.dot_dimension_numbers<[2], [2], [1], [1], [0, 0, 0, 1, 1, 1], [0], [0]>} : vector<2x8x8xf32>, vector<2x8x8xf32>, vector<2x8x8xf32> -> vector<2x8x8xf32>
    %cst_24 = arith.constant dense<0xFF800000> : vector<2x8xf32>
    %43 = vector.multi_reduction <maximumf>, %42, %cst_24 [2] : vector<2x8x8xf32> to vector<2x8xf32>
    %44 = vector.shape_cast %43 : vector<2x8xf32> to vector<2x8x1xf32>
    %45 = vector.broadcast %44 : vector<2x8x1xf32> to vector<2x8x8xf32>
    %46 = arith.subf %42, %45 : vector<2x8x8xf32>
    %47 = math.exp %46 : vector<2x8x8xf32>
    %cst_25 = arith.constant dense<0.000000e+00> : vector<2x8xf32>
    %48 = vector.multi_reduction <add>, %47, %cst_25 [2] : vector<2x8x8xf32> to vector<2x8xf32>
    %49 = vector.shape_cast %48 : vector<2x8xf32> to vector<2x8x1xf32>
    %50 = tpu.reciprocal %49 {approx = true} : vector<2x8x1xf32> -> vector<2x8x1xf32>
    %51 = vector.broadcast %50 : vector<2x8x1xf32> to vector<2x8x8xf32>
    %52 = arith.mulf %47, %51 : vector<2x8x8xf32>
    %cst_26 = arith.constant dense<0.000000e+00> : vector<2x8x8xf32>
    %53 = tpu.matmul %52, %41, %cst_26 {dimension_numbers = #tpu.dot_dimension_numbers<[2], [1], [1], [2], [0, 0, 0, 1, 1, 2], [0], [0]>} : vector<2x8x8xf32>, vector<2x8x8xf32>, vector<2x8x8xf32> -> vector<2x8x8xf32>
    %54 = vector.extract_strided_slice %21 {offsets = [0, 0, 16], sizes = [2, 8, 8], strides = [1, 1, 1]} : vector<2x8x32xf32> to vector<2x8x8xf32>
    %55 = vector.extract_strided_slice %22 {offsets = [0, 0, 16], sizes = [2, 8, 8], strides = [1, 1, 1]} : vector<2x8x32xf32> to vector<2x8x8xf32>
    %56 = vector.extract_strided_slice %23 {offsets = [0, 0, 16], sizes = [2, 8, 8], strides = [1, 1, 1]} : vector<2x8x32xf32> to vector<2x8x8xf32>
    %cst_27 = arith.constant dense<0.000000e+00> : vector<2x8x8xf32>
    %57 = tpu.matmul %54, %55, %cst_27 {dimension_numbers = #tpu.dot_dimension_numbers<[2], [2], [1], [1], [0, 0, 0, 1, 1, 1], [0], [0]>} : vector<2x8x8xf32>, vector<2x8x8xf32>, vector<2x8x8xf32> -> vector<2x8x8xf32>
    %cst_28 = arith.constant dense<0xFF800000> : vector<2x8xf32>
    %58 = vector.multi_reduction <maximumf>, %57, %cst_28 [2] : vector<2x8x8xf32> to vector<2x8xf32>
    %59 = vector.shape_cast %58 : vector<2x8xf32> to vector<2x8x1xf32>
    %60 = vector.broadcast %59 : vector<2x8x1xf32> to vector<2x8x8xf32>
    %61 = arith.subf %57, %60 : vector<2x8x8xf32>
    %62 = math.exp %61 : vector<2x8x8xf32>
    %cst_29 = arith.constant dense<0.000000e+00> : vector<2x8xf32>
    %63 = vector.multi_reduction <add>, %62, %cst_29 [2] : vector<2x8x8xf32> to vector<2x8xf32>
    %64 = vector.shape_cast %63 : vector<2x8xf32> to vector<2x8x1xf32>
    %65 = tpu.reciprocal %64 {approx = true} : vector<2x8x1xf32> -> vector<2x8x1xf32>
    %66 = vector.broadcast %65 : vector<2x8x1xf32> to vector<2x8x8xf32>
    %67 = arith.mulf %62, %66 : vector<2x8x8xf32>
    %cst_30 = arith.constant dense<0.000000e+00> : vector<2x8x8xf32>
    %68 = tpu.matmul %67, %56, %cst_30 {dimension_numbers = #tpu.dot_dimension_numbers<[2], [1], [1], [2], [0, 0, 0, 1, 1, 2], [0], [0]>} : vector<2x8x8xf32>, vector<2x8x8xf32>, vector<2x8x8xf32> -> vector<2x8x8xf32>
    %69 = vector.extract_strided_slice %21 {offsets = [0, 0, 24], sizes = [2, 8, 8], strides = [1, 1, 1]} : vector<2x8x32xf32> to vector<2x8x8xf32>
    %70 = vector.extract_strided_slice %22 {offsets = [0, 0, 24], sizes = [2, 8, 8], strides = [1, 1, 1]} : vector<2x8x32xf32> to vector<2x8x8xf32>
    %71 = vector.extract_strided_slice %23 {offsets = [0, 0, 24], sizes = [2, 8, 8], strides = [1, 1, 1]} : vector<2x8x32xf32> to vector<2x8x8xf32>
    %cst_31 = arith.constant dense<0.000000e+00> : vector<2x8x8xf32>
    %72 = tpu.matmul %69, %70, %cst_31 {dimension_numbers = #tpu.dot_dimension_numbers<[2], [2], [1], [1], [0, 0, 0, 1, 1, 1], [0], [0]>} : vector<2x8x8xf32>, vector<2x8x8xf32>, vector<2x8x8xf32> -> vector<2x8x8xf32>
    %cst_32 = arith.constant dense<0xFF800000> : vector<2x8xf32>
    %73 = vector.multi_reduction <maximumf>, %72, %cst_32 [2] : vector<2x8x8xf32> to vector<2x8xf32>
    %74 = vector.shape_cast %73 : vector<2x8xf32> to vector<2x8x1xf32>
    %75 = vector.broadcast %74 : vector<2x8x1xf32> to vector<2x8x8xf32>
    %76 = arith.subf %72, %75 : vector<2x8x8xf32>
    %77 = math.exp %76 : vector<2x8x8xf32>
    %cst_33 = arith.constant dense<0.000000e+00> : vector<2x8xf32>
    %78 = vector.multi_reduction <add>, %77, %cst_33 [2] : vector<2x8x8xf32> to vector<2x8xf32>
    %79 = vector.shape_cast %78 : vector<2x8xf32> to vector<2x8x1xf32>
    %80 = tpu.reciprocal %79 {approx = true} : vector<2x8x1xf32> -> vector<2x8x1xf32>
    %81 = vector.broadcast %80 : vector<2x8x1xf32> to vector<2x8x8xf32>
    %82 = arith.mulf %77, %81 : vector<2x8x8xf32>
    %cst_34 = arith.constant dense<0.000000e+00> : vector<2x8x8xf32>
    %83 = tpu.matmul %82, %71, %cst_34 {dimension_numbers = #tpu.dot_dimension_numbers<[2], [1], [1], [2], [0, 0, 0, 1, 1, 2], [0], [0]>} : vector<2x8x8xf32>, vector<2x8x8xf32>, vector<2x8x8xf32> -> vector<2x8x8xf32>
    %84 = tpu.concatenate %38, %53, %68, %83 in 2 : vector<2x8x8xf32>, vector<2x8x8xf32>, vector<2x8x8xf32>, vector<2x8x8xf32> -> vector<2x8x32xf32>
    %85 = vector.shape_cast %84 : vector<2x8x32xf32> to vector<16x32xf32>
    %86 = arith.truncf %85 : vector<16x32xf32> to vector<16x32xbf16>
    %c0_35 = arith.constant 0 : index
    %c0_36 = arith.constant 0 : index
    %87 = vector.load %arg9[%c0_35, %c0_36] : memref<32x32xbf16, #tpu.memory_space<vmem>>, vector<32x32xbf16>
    %cst_37 = arith.constant dense<0.000000e+00> : vector<16x32xf32>
    %88 = tpu.matmul %86, %87, %cst_37 {dimension_numbers = #tpu.dot_dimension_numbers<[1], [0], [0], [1], [0, 0, 1, 1], [], []>} : vector<16x32xbf16>, vector<32x32xbf16>, vector<16x32xf32> -> vector<16x32xf32>
    %c0_38 = arith.constant 0 : index
    %c0_39 = arith.constant 0 : index
    %89 = vector.load %arg10[%c0_38, %c0_39] : memref<1x32xf32, #tpu.memory_space<vmem>>, vector<1x32xf32>
    %90 = vector.broadcast %89 : vector<1x32xf32> to vector<16x32xf32>
    %91 = arith.addf %88, %90 : vector<16x32xf32>
    %c0_40 = arith.constant 0 : index
    %c0_41 = arith.constant 0 : index
    %92 = vector.load %arg11[%c0_40, %c0_41] : memref<16x32xf32, #tpu.memory_space<vmem>>, vector<16x32xf32>
    tpu.vector_store %arg11[%c0_40, %c0_41], %91 {strides = array<i32>} : memref<16x32xf32, #tpu.memory_space<vmem>>, vector<16x32xf32>,
    return
  }
}

</mosaic_0001>

<bundles_post_ra>
// kernel: multi_headed_attn.1
= control target key start
LH: loop header
LB: loop body
LE: loop exit
PB: predicated region body
PF: predicated region fallthrough
CT: control target
= control target key end

     0   :  { %16 = vsyncpa [#allocation3], 0  ;;  %s2636_s0 = inlined_call_operand.vmem [shape: f32[16,32], index: 0, kind: input, shape index: {}]   ;;  %s2637_s1 = inlined_call_operand.vmem [shape: f32[16,32], index: 1, kind: input, shape index: {}]   ;;  %s2638_s2 = inlined_call_operand.vmem [shape: f32[16,32], index: 2, kind: input, shape index: {}]   ;;  %s2639_s3 = inlined_call_operand.hbm [shape: bf16[32,32], index: 3, kind: input, shape index: {}]   ;;  %s2640_s4 = inlined_call_operand.vmem [shape: f32[1,32], index: 4, kind: input, shape index: {}]   ;;  %s2641_s5 = inlined_call_operand.hbm [shape: bf16[32,32], index: 5, kind: input, shape index: {}]   ;;  %s2642_s6 = inlined_call_operand.hbm [shape: f32[1,32], index: 6, kind: input, shape index: {}]   ;;  %s2643_s7 = inlined_call_operand.hbm [shape: bf16[32,32], index: 7, kind: input, shape index: {}]   ;;  %s2644_s8 = inlined_call_operand.hbm [shape: f32[1,32], index: 8, kind: input, shape index: {}]   ;;  %s2645_s9 = inlined_call_operand.hbm [shape: bf16[32,32], index: 9, kind: input, shape index: {}]   ;;  %s2646_s10 = inlined_call_operand.hbm [shape: f32[1,32], index: 10, kind: input, shape index: {}]   ;;  %s2647_s11 = inlined_call_operand.hbm [shape: f32[16,32], index: 11, kind: output, shape index: {}]  }
   0x1   :  { %17 = vsyncpa [#allocation6], 0 }
   0x2   :  { %18 = vsyncpa [#allocation9], 0 }
   0x3   :  { %19 = vsyncpa [#allocation12], 0 }
   0x4   :  { %20 = vsyncpa [#allocation4], 0  ;;  %s2231_s17 = smov [#allocation5]   ;;  %s2232_s19 = smov [#allocation8]  }
   0x5   :  { %s46_s18 = sshll.u32 %s2231_s17, 4  ;;  %s68_s20 = sshll.u32 %s2232_s19, 4  ;;  %s47_s18 = int_to_ptr.vmem [resolvable:$true] %s46_s18  ;;  %s2310_s20 = int_to_ptr.vmem [resolvable:$true] %s68_s20 }
   0x6   :  { %s2045_s23 = scalar_lea.hbm %s2641_s5, 256 }
   0x7   :  { %p2046_p0 = scmp.ne.s32.totalorder %s2641_s5, %s2045_s23  ;;  %p2049_p1 = scmp.lt.u32.totalorder %s2045_s23, %s2641_s5 }
   0x9   :  { %p2051_p2 = pnand %p2049_p1, %p2046_p0 }
   0xb   :  { %2054 = shalt.err (!%p2051_p2)
}
   0xc   :  { %s2055_s28 = scalar_lea.vmem %s47_s18, 256  ;;  %p2060_p4 = scmp.lt.s32.totalorder %s47_s18, %s47_s18 }
   0xd   :  { %p2056_p3 = scmp.ne.s32.totalorder %s47_s18, %s2055_s28  ;;  %p2061_p5 = scmp.lt.s32.totalorder %s2055_s28, %s2055_s28 }
   0xf   :  { %p2062_p6 = por %p2061_p5, %p2060_p4 }
  0x11   :  { %p2063_p7 = pnand %p2062_p6, %p2056_p3 }
  0x13   :  { %2066 = shalt.err (!%p2063_p7)
}
  0x14   :  { %s2233_s29 = smov 64   ;;  %s2234_s30 = smov 4  }
  0x15   :  { %52 = dma.hbm_to_vmem [thread:$0]  %s2641_s5, 256, %s47_s18, [#allocation6], %s2233_s29, %s2233_s29, %s2234_s30  }
  0x16   :  { %s2067_s16 = scalar_lea.hbm %s2643_s7, 256 }
  0x17   :  { %p2068_p8 = scmp.ne.s32.totalorder %s2643_s7, %s2067_s16  ;;  %p2071_p9 = scmp.lt.u32.totalorder %s2067_s16, %s2643_s7 }
  0x19   :  { %p2073_p10 = pnand %p2071_p9, %p2068_p8 }
  0x1b   :  { %2076 = shalt.err (!%p2073_p10)
}
  0x1c   :  { %s2077_s23 = scalar_lea.vmem %s2310_s20, 256  ;;  %p2082_p12 = scmp.lt.s32.totalorder %s2310_s20, %s2310_s20 }
  0x1d   :  { %p2078_p11 = scmp.ne.s32.totalorder %s2310_s20, %s2077_s23  ;;  %p2083_p13 = scmp.lt.s32.totalorder %s2077_s23, %s2077_s23 }
  0x1f   :  { %p2084_p0 = por %p2083_p13, %p2082_p12 }
  0x21   :  { %p2085_p1 = pnand %p2084_p0, %p2078_p11 }
  0x23   :  { %2088 = shalt.err (!%p2085_p1)
}
  0x24   :  { %74 = dma.hbm_to_vmem [thread:$0]  %s2643_s7, 256, %s2310_s20, [#allocation9], %s2233_s29, %s2233_s29, %s2234_s30  }
  0x25   :  { %s2235_s24 = smov [#allocation11]   ;;  %s2236_s26 = smov [#allocation2]  }
  0x26   :  { %s90_s25 = sshll.u32 %s2235_s24, 4  ;;  %s32_s27 = sshll.u32 %s2236_s26, 4  ;;  %s91_s25 = int_to_ptr.vmem [resolvable:$true] %s90_s25  ;;  %s2347_s27 = int_to_ptr.vmem [resolvable:$true] %s32_s27 }
  0x27   :  { %s2089_s13 = scalar_lea.hbm %s2645_s9, 256 }
  0x28   :  { %p2090_p2 = scmp.ne.s32.totalorder %s2645_s9, %s2089_s13  ;;  %p2093_p3 = scmp.lt.u32.totalorder %s2089_s13, %s2645_s9 }
  0x2a   :  { %p2095_p4 = pnand %p2093_p3, %p2090_p2 }
  0x2c   :  { %2098 = shalt.err (!%p2095_p4)
}
  0x2d   :  { %s2099_s7 = scalar_lea.vmem %s91_s25, 256  ;;  %p2104_p6 = scmp.lt.s32.totalorder %s91_s25, %s91_s25 }
  0x2e   :  { %p2100_p5 = scmp.ne.s32.totalorder %s91_s25, %s2099_s7  ;;  %p2105_p7 = scmp.lt.s32.totalorder %s2099_s7, %s2099_s7 }
  0x30   :  { %p2106_p8 = por %p2105_p7, %p2104_p6 }
  0x32   :  { %p2107_p9 = pnand %p2106_p8, %p2100_p5 }
  0x34   :  { %2110 = shalt.err (!%p2107_p9)
}
  0x35   :  { %96 = dma.hbm_to_vmem [thread:$0]  %s2645_s9, 256, %s91_s25, [#allocation12], %s2233_s29, %s2233_s29, %s2234_s30  }
  0x36   :  { %s2111_s23 = scalar_lea.hbm %s2639_s3, 256 }
  0x37   :  { %p2112_p10 = scmp.ne.s32.totalorder %s2639_s3, %s2111_s23  ;;  %p2115_p11 = scmp.lt.u32.totalorder %s2111_s23, %s2639_s3 }
  0x39   :  { %p2117_p12 = pnand %p2115_p11, %p2112_p10 }
  0x3b   :  { %2120 = shalt.err (!%p2117_p12)
}
  0x3c   :  { %s2121_s28 = scalar_lea.vmem %s2347_s27, 256  ;;  %p2126_p0 = scmp.lt.s32.totalorder %s2347_s27, %s2347_s27 }
  0x3d   :  { %p2122_p13 = scmp.ne.s32.totalorder %s2347_s27, %s2121_s28  ;;  %p2127_p1 = scmp.lt.s32.totalorder %s2121_s28, %s2121_s28 }
  0x3f   :  { %p2128_p2 = por %p2127_p1, %p2126_p0 }
  0x41   :  { %p2129_p3 = pnand %p2128_p2, %p2122_p13 }
  0x43   :  { %2132 = shalt.err (!%p2129_p3)
}
  0x44   :  { %38 = dma.hbm_to_vmem [thread:$0]  %s2639_s3, 256, %s2347_s27, [#allocation3], %s2233_s29, %s2233_s29, %s2234_s30  }
  0x45   :  { %s2237_s12 = smov [#allocation7]   ;;  %s2238_s14 = smov [#allocation10]  }
  0x46   :  { %s59_s13 = sshll.u32 %s2237_s12, 4  ;;  %s81_s15 = sshll.u32 %s2238_s14, 4  ;;  %s60_s13 = int_to_ptr.vmem [resolvable:$true] %s59_s13  ;;  %s82_s15 = int_to_ptr.vmem [resolvable:$true] %s81_s15 }
  0x47   :  { %s2133_s7 = scalar_lea.hbm %s2642_s6, 16 }
  0x48   :  { %p2134_p4 = scmp.ne.s32.totalorder %s2642_s6, %s2133_s7  ;;  %p2137_p5 = scmp.lt.u32.totalorder %s2133_s7, %s2642_s6 }
  0x4a   :  { %p2139_p6 = pnand %p2137_p5, %p2134_p4 }
  0x4c   :  { %2142 = shalt.err (!%p2139_p6)
}
  0x4d   :  { %s2143_s3 = scalar_lea.vmem %s60_s13, 16  ;;  %s2147_s29 = scalar_lea.vmem %s60_s13, 32 }
  0x4e   :  { %p2144_p7 = scmp.ne.s32.totalorder %s60_s13, %s2143_s3  ;;  %p2148_p8 = scmp.lt.s32.totalorder %s60_s13, %s60_s13 }
  0x4f   :  { %p2149_p9 = scmp.lt.s32.totalorder %s2147_s29, %s2143_s3 }
  0x51   :  { %p2150_p10 = por %p2149_p9, %p2148_p8 }
  0x53   :  { %p2151_p11 = pnand %p2150_p10, %p2144_p7 }
  0x55   :  { %2154 = shalt.err (!%p2151_p11)
}
  0x56   :  { %62 = dma.hbm_to_vmem [thread:$0]  %s2642_s6, 16, %s60_s13, [#allocation6]  }
  0x57   :  { %s2155_s18 = scalar_lea.hbm %s2644_s8, 16 }
  0x58   :  { %p2156_p12 = scmp.ne.s32.totalorder %s2644_s8, %s2155_s18  ;;  %p2159_p13 = scmp.lt.u32.totalorder %s2155_s18, %s2644_s8 }
  0x5a   :  { %p2161_p0 = pnand %p2159_p13, %p2156_p12 }
  0x5c   :  { %2164 = shalt.err (!%p2161_p0)
}
  0x5d   :  { %s2165_s25 = scalar_lea.vmem %s82_s15, 16  ;;  %s2169_s12 = scalar_lea.vmem %s82_s15, 32 }
  0x5e   :  { %p2166_p1 = scmp.ne.s32.totalorder %s82_s15, %s2165_s25  ;;  %p2170_p2 = scmp.lt.s32.totalorder %s82_s15, %s82_s15 }
  0x5f   :  { %p2171_p3 = scmp.lt.s32.totalorder %s2169_s12, %s2165_s25 }
  0x61   :  { %p2172_p4 = por %p2171_p3, %p2170_p2 }
  0x63   :  { %p2173_p5 = pnand %p2172_p4, %p2166_p1 }
  0x65   :  { %2176 = shalt.err (!%p2173_p5)
}
  0x66   :  { %84 = dma.hbm_to_vmem [thread:$0]  %s2644_s8, 16, %s82_s15, [#allocation9]  }
  0x67   :  { %s2239_s14 = smov [#allocation13]   ;;  %s2177_s20 = scalar_lea.hbm %s2646_s10, 16 }
  0x68   :  { %s103_s16 = sshll.u32 %s2239_s14, 4  ;;  %p2178_p6 = scmp.ne.s32.totalorder %s2646_s10, %s2177_s20  ;;  %s104_s16 = int_to_ptr.vmem [resolvable:$true] %s103_s16 }
  0x69   :  { %p2181_p7 = scmp.lt.u32.totalorder %s2177_s20, %s2646_s10 }
  0x6b   :  { %p2183_p8 = pnand %p2181_p7, %p2178_p6 }
  0x6d   :  { %2186 = shalt.err (!%p2183_p8)
}
  0x6e   :  { %s2187_s29 = scalar_lea.vmem %s104_s16, 16  ;;  %s2191_s8 = scalar_lea.vmem %s104_s16, 32 }
  0x6f   :  { %p2188_p9 = scmp.ne.s32.totalorder %s104_s16, %s2187_s29  ;;  %p2192_p10 = scmp.lt.s32.totalorder %s104_s16, %s104_s16 }
  0x70   :  { %p2193_p11 = scmp.lt.s32.totalorder %s2191_s8, %s2187_s29 }
  0x72   :  { %p2194_p12 = por %p2193_p11, %p2192_p10 }
  0x74   :  { %p2195_p13 = pnand %p2194_p12, %p2188_p9 }
  0x76   :  { %2198 = shalt.err (!%p2195_p13)
}
  0x77   :  { %106 = dma.hbm_to_vmem [thread:$0]  %s2646_s10, 16, %s104_s16, [#allocation12]  }
  0x78   :  { %2221 = dma.done.wait [#allocation3], 256  }
  0x79   :  { %2222 = vsyncadd [#allocation3], 4294967040 }
  0x7a   :  { %2223 = dma.done.wait [#allocation6], 272  }
  0x7b   :  { %2224 = vsyncadd [#allocation6], 4294967024 }
  0x7c   :  { %2225 = dma.done.wait [#allocation9], 272  }
  0x7d   :  { %2226 = vsyncadd [#allocation9], 4294967024 }
  0x7e   :  { %2227 = dma.done.wait [#allocation12], 272  }
  0x7f   :  { %2228 = vsyncadd [#allocation12], 4294967024  ;;  %v2240_v0 = vmov 0.0   ;;  %vm2241_vm0 = vmmov 0   ;;  %v2005_v1 = vld [vmem:[#allocation2] sm:$0xff]   ;;  %v2006_v2 = vld [vmem:[#allocation2 + $0x8] sm:$0xff]  }
  0x80   :  { %1859 = vmatprep.subr.bf16.mxu1 %v2240_v0  ;;  %1863 = vmatprep.mubr.msk.bf16.mxu1 %vm2241_vm0, %v2240_v0  ;;  %v129_v3 = vld [vmem:[%s2636_s0] sm:$0xff]  ;;  %v130_v4 = vld [vmem:[%s2636_s0 + $0x8] sm:$0xff]  ;;  %vm155_vm1 = vcmask 261120   ;;  %v2007_v6 = vld [vmem:[#allocation5] sm:$0xff]   ;;  %vm340_vm2 = vcmask 64512   ;;  %s2242_s9 = smov 120  }
  0x81   :  { %1875 = vmatprep.subr.bf16.mxu0 %v2240_v0  ;;  %1879 = vmatprep.mubr.msk.bf16.mxu0 %vm2241_vm0, %v2240_v0  ;;  %v131_v5 = vpack.c.bf16 %v130_v4, %v129_v3  ;;  %v2008_v7 = vld [vmem:[#allocation5 + $0x8] sm:$0xff]   ;;  %v200_v8 = vld [vmem:[%s2637_s1] sm:$0xff]  ;;  %v201_v9 = vld [vmem:[%s2637_s1 + $0x8] sm:$0xff]  ;;  %s2244_s13 = smov 104   ;;  %s2245_s14 = smov 8   ;;  %vm1679_vm3 = vcmask 130048  }
  0x82   :  { %1860 = vmatpush3.bf16.msra.mxu1 %v2005_v1  ;;  %v202_v10 = vpack.c.bf16 %v201_v9, %v200_v8  ;;  %v1779_v15 = vld [vmem:[#allocation7] ss:$0 sm:$0xff]  ;;  %v2009_v25 = vld [vmem:[#allocation8] sm:$0xff]   ;;  %v2010_v26 = vld [vmem:[#allocation8 + $0x8] sm:$0xff]   ;;  %s2246_s16 = smov 16   ;;  %s2247_s17 = smov 24  }
  0x83   :  { %1861 = vmatprep.subr.bf16.mxu1 %v2240_v0  ;;  %v1775_v17 = vld [vmem:[%s2640_s4] ss:$0 sm:$0xff]  ;;  %1876 = vmatpush3.bf16.msra.mxu0 %v2009_v25  ;;  %v271_v28 = vld [vmem:[%s2638_s2 + $0x8] sm:$0xff]  ;;  %v1783_v48 = vld [vmem:[#allocation10] ss:$0 sm:$0xff]  ;;  %vm1682_vm4 = vcmask 195584  }
  0x84   :  { %v270_v27 = vld [vmem:[%s2638_s2] sm:$0xff]  ;;  %1877 = vmatprep.subr.bf16.mxu0 %v2240_v0  ;;  %s2243_s2 = smov 112   ;;  %s2248_s7 = smov [#allocation14]  }
  0x85   :  { %v272_v29 = vpack.c.bf16 %v271_v28, %v270_v27  ;;  %s1760_s20 = sshll.u32 %s2248_s7, 4  ;;  %s1761_s20 = int_to_ptr.vmem [resolvable:$true] %s1760_s20 }
  0x86   :  { %1862 = vmatpush3.bf16.msra.mxu1 %v2006_v2  ;;  %s2199_s19 = scalar_lea.vmem %s1761_s20, 256  ;;  %p2204_p1 = scmp.lt.s32.totalorder %s1761_s20, %s1761_s20 }
  0x87   :  { %1867 = vmatprep.subr.bf16.mxu1 %v2240_v0  ;;  %1878 = vmatpush3.bf16.msra.mxu0 %v2010_v26  ;;  %p2200_p0 = scmp.ne.s32.totalorder %s1761_s20, %s2199_s19  ;;  %p2205_p2 = scmp.lt.s32.totalorder %s2199_s19, %s2199_s19 }
  0x88   :  { %1893 = vmatprep.subr.mxu0 %v2240_v0 }
  0x89   :  { %1864 = vmatmul.mubr.msk.bf16.vlgmr.msra.gmra.mrb[0].mxu1 %vm155_vm1, %v131_v5  ;;  %p2206_p3 = por %p2205_p2, %p2204_p1 }
  0x8a   :  { %1868 = vmatpush3.bf16.msra.mxu1 %v2007_v6  ;;  %1871 = vmatprep.mubr.msk.bf16.mxu1 %vm2241_vm0, %v2240_v0 }
  0x8b   :  { %1869 = vmatprep.subr.bf16.mxu1 %v2240_v0  ;;  %1880 = vmatmul.mubr.msk.bf16.vlgmr.msra.gmra.mrb[0].mxu0 %vm155_vm1, %v272_v29  ;;  %p2207_p4 = pnand %p2206_p3, %p2200_p0 }
  0x8c   :  { %1895 = vmatprep.mubr.msk.f32.mxu0 %vm2241_vm0, %v2240_v0 }
  0x8e   :  { %1870 = vmatpush3.bf16.msra.mxu1 %v2008_v7 }
  0x8f   :  { %1883 = vmatprep.subr.mxu1 %v2240_v0 }
  0x91   :  { %1872 = vmatmul.mubr.msk.bf16.vlgmr.msra.gmra.mrb[4].mxu1 %vm155_vm1, %v202_v10 }
  0x92   :  { %1885 = vmatprep.mubr.msk.f32.mxu1 %vm2241_vm0, %v2240_v0 }
 0x15c   :  { %v193_v11 = vpop.f32.mrb[0].mxu1 }
 0x15d   :  { %v1865_v12 = vpop.f32.mrb[1].mxu1  ;;  %v2457_v23 = vadd.f32 %v1775_v17, %v193_v11 }
 0x15e   :  { %v196_v13 = vpop.f32.mrb[2].mxu1  ;;  %v333_v46 = vpop.f32.mrb[0].mxu0 }
 0x15f   :  { %v1866_v14 = vpop.f32.mrb[3].mxu1  ;;  %v2468_v24 = vadd.f32 %v1775_v17, %v196_v13  ;;  %v1881_v47 = vpop.f32.mrb[1].mxu0  ;;  %v2494_v50 = vadd.f32 %v1783_v48, %v333_v46 }
 0x160   :  { %v336_v49 = vpop.f32.mrb[2].mxu0 }
 0x161   :  { %v1882_v51 = vpop.f32.mrb[3].mxu0  ;;  %v2496_v52 = vadd.f32 %v1783_v48, %v336_v49  ;;  %1894 = vmatpush3.msra.mxu0 %v2494_v50 }
 0x162   :  { %1903 = vmatprep.subr.mxu0 %v2240_v0 }
 0x164   :  { %v263_v16 = vpop.f32.mrb[4].mxu1 }
 0x165   :  { %v2451_v18 = vadd.f32 %v1779_v15, %v263_v16  ;;  %v1873_v19 = vpop.f32.mrb[5].mxu1 }
 0x166   :  { %v266_v20 = vpop.f32.mrb[6].mxu1 }
 0x167   :  { %v2453_v21 = vadd.f32 %v1779_v15, %v266_v20  ;;  %v1874_v22 = vpop.f32.mrb[7].mxu1  ;;  %1884 = vmatpush3.xpose.msk.msra.mxu1 %vm340_vm2, %v2451_v18 }
 0x168   :  { %1888 = vmatprep.subr.mxu1 %v2240_v0 }
 0x169   :  { %741 = vrot.lane.b32.xlu1 %v2453_v21, %s2242_s9 }
 0x16a   :  { %1886 = vmatmul.mubr.msk.f32.vlgmr.msra.gmra.mrb[8].mxu1 %vm340_vm2, %v2457_v23 }
 0x16b   :  { %1889 = vmatpush3.xpose.msk.msra.mxu1 %vm340_vm2, %v2453_v21  ;;  %1890 = vmatprep.mubr.msk.f32.mxu1 %vm2241_vm0, %v2240_v0 }
 0x16c   :  { %1898 = vmatprep.subr.mxu1 %v2240_v0 }
 0x16d   :  { %661 = vrot.lane.b32.xlu1 %v2457_v23, %s2242_s9 }
 0x16e   :  { %1891 = vmatmul.mubr.msk.f32.vlgmr.msra.gmra.mrb[10].mxu1 %vm340_vm2, %v2468_v24 }
 0x16f   :  { %1900 = vmatprep.mubr.msk.f32.mxu1 %vm2241_vm0, %v2240_v0  ;;  %1899 = vmatpush3.msra.mxu1 %v2496_v52 }
 0x170   :  { %1908 = vmatprep.subr.mxu1 %v2240_v0 }
 0x1db   :  { %v742_v53 = vpop.permute.xlu1 %741 }
 0x1df   :  { %v662_v54 = vpop.permute.xlu1 %661 }
 0x23d   :  { %v413_v30 = vpop.f32.mrb[8].mxu1 }
 0x23e   :  { %v1887_v31 = vpop.f32.mrb[9].mxu1  ;;  %v493_v32 = vsel %vm340_vm2, %v413_v30, -inf }
 0x23f   :  { %494 = vmax.xlane.f32.xlu0 %v493_v32 }
 0x241   :  { %v489_v33 = vpop.f32.mrb[10].mxu1 }
 0x242   :  { %v1892_v34 = vpop.f32.mrb[11].mxu1  ;;  %v496_v35 = vsel %vm340_vm2, %v489_v33, -inf }
 0x243   :  { %497 = vmax.xlane.f32.xlu0 %v496_v35 }
 0x259   :  { %663 = vrot.lane.b32.xlu0 %v2451_v18, %s2242_s9 }
 0x2cc   :  { %v495_v36 = vpop.xlane.xlu0 %494 }
 0x2cd   :  { %v499_v37 = vsub.f32 %v413_v30, %v495_v36 }
 0x2cf   :  { %v501_v38 = vmul.f32 1.442695, %v499_v37 }
 0x2d0   :  { %v498_v39 = vpop.xlane.xlu0 %497 }
 0x2d1   :  { %2013 = vpow2.f32 %v501_v38  ;;  %v500_v40 = vsub.f32 %v489_v33, %v498_v39 }
 0x2d3   :  { %v503_v41 = vmul.f32 1.442695, %v500_v40 }
 0x2d4   :  { %v664_v59 = vpop.permute.xlu0 %663 }
 0x2d5   :  { %2015 = vpow2.f32 %v503_v41 }
 0x2db   :  { %v2014_v42 = vpop.eup %2013 }
 0x2dc   :  { %v505_v43 = vsel %vm340_vm2, %v2014_v42, 0.0 }
 0x2dd   :  { %506 = vadd.xlane.f32.xlu1 %v505_v43 }
 0x2df   :  { %v2016_v44 = vpop.eup %2015 }
 0x2e0   :  { %v508_v45 = vsel %vm340_vm2, %v2016_v44, 0.0 }
 0x2e1   :  { %509 = vadd.xlane.f32.xlu1 %v508_v45 }
 0x2f2   :  { %739 = vrot.lane.b32.xlu1 %v2468_v24, %s2242_s9 }
 0x36a   :  { %v507_v55 = vpop.xlane.xlu1 %506 }
 0x36b   :  { %2017 = vrcp.f32 %v507_v55 }
 0x36e   :  { %v510_v56 = vpop.xlane.xlu1 %509 }
 0x36f   :  { %2019 = vrcp.f32 %v510_v56 }
 0x372   :  { %v740_v62 = vpop.permute.xlu1 %739 }
 0x375   :  { %v2018_v57 = vpop.eup %2017 }
 0x376   :  { %v513_v58 = vmul.f32 %v2018_v57, %v2014_v42 }
 0x378   :  { %1896 = vmatmul.mubr.msk.f32.vlgmr.msra.gmra.mrb[4].mxu0 %vm340_vm2, %v513_v58 }
 0x379   :  { %v2020_v60 = vpop.eup %2019  ;;  %1904 = vmatpush3.xpose.msk.msra.mxu0 %vm340_vm2, %v664_v59  ;;  %1905 = vmatprep.mubr.msk.f32.mxu0 %vm2241_vm0, %v2240_v0 }
 0x37a   :  { %v514_v61 = vmul.f32 %v2020_v60, %v2016_v44  ;;  %1913 = vmatprep.subr.mxu0 %v2240_v0 }
 0x37c   :  { %1901 = vmatmul.mubr.msk.f32.vlgmr.msra.gmra.mrb[12].mxu1 %vm340_vm2, %v514_v61  ;;  %1906 = vmatmul.mubr.msk.f32.vlgmr.msra.gmra.mrb[6].mxu0 %vm340_vm2, %v662_v54 }
 0x37d   :  { %1909 = vmatpush3.xpose.msk.msra.mxu1 %vm340_vm2, %v742_v53  ;;  %1910 = vmatprep.mubr.msk.f32.mxu1 %vm2241_vm0, %v2240_v0 }
 0x37e   :  { %1918 = vmatprep.subr.mxu1 %v2240_v0  ;;  %1915 = vmatprep.mubr.msk.f32.mxu0 %vm2241_vm0, %v2240_v0 }
 0x380   :  { %1911 = vmatmul.mubr.msk.f32.vlgmr.msra.gmra.mrb[14].mxu1 %vm340_vm2, %v740_v62 }
 0x381   :  { %1920 = vmatprep.mubr.msk.f32.mxu1 %vm2241_vm0, %v2240_v0 }
 0x44b   :  { %v2520_v63 = vpop.f32.mrb[4].mxu0 }
 0x44c   :  { %v1897_v1 = vpop.f32.mrb[5].mxu0 }
 0x44f   :  { %v2522_v2 = vpop.f32.mrb[12].mxu1  ;;  %v735_v3 = vpop.f32.mrb[6].mxu0 }
 0x450   :  { %v1902_v4 = vpop.f32.mrb[13].mxu1  ;;  %v1907_v5 = vpop.f32.mrb[7].mxu0  ;;  %v817_v6 = vsel %vm340_vm2, %v735_v3, -inf }
 0x451   :  { %818 = vmax.xlane.f32.xlu0 %v817_v6 }
 0x453   :  { %v813_v7 = vpop.f32.mrb[14].mxu1 }
 0x454   :  { %v1912_v8 = vpop.f32.mrb[15].mxu1  ;;  %v820_v9 = vsel %vm340_vm2, %v813_v7, -inf }
 0x455   :  { %821 = vmax.xlane.f32.xlu1 %v820_v9 }
 0x466   :  { %917 = vrot.lane.b32.xlu1 %v2496_v52, %s2242_s9 }
 0x467   :  { %840 = vrot.lane.b32.xlu0 %v2494_v50, %s2242_s9 }
 0x46a   :  { %995 = vrot.lane.b32.xlu1 %v2451_v18, %s2243_s2 }
 0x46e   :  { %1073 = vrot.lane.b32.xlu1 %v2453_v21, %s2243_s2 }
 0x472   :  { %1071 = vrot.lane.b32.xlu1 %v2468_v24, %s2243_s2 }
 0x4de   :  { %v819_v10 = vpop.xlane.xlu0 %818 }
 0x4df   :  { %v823_v11 = vsub.f32 %v735_v3, %v819_v10 }
 0x4e1   :  { %v825_v12 = vmul.f32 1.442695, %v823_v11 }
 0x4e2   :  { %v841_v13 = vpop.permute.xlu0 %840  ;;  %v822_v14 = vpop.xlane.xlu1 %821 }
 0x4e3   :  { %2021 = vpow2.f32 %v825_v12  ;;  %v824_v15 = vsub.f32 %v813_v7, %v822_v14  ;;  %1914 = vmatpush3.msra.mxu0 %v841_v13 }
 0x4e4   :  { %1923 = vmatprep.subr.mxu0 %v2240_v0 }
 0x4e5   :  { %v827_v16 = vmul.f32 1.442695, %v824_v15 }
 0x4e6   :  { %v918_v17 = vpop.permute.xlu1 %917 }
 0x4e7   :  { %2023 = vpow2.f32 %v827_v16  ;;  %1919 = vmatpush3.msra.mxu1 %v918_v17 }
 0x4e8   :  { %1928 = vmatprep.subr.mxu1 %v2240_v0 }
 0x4ea   :  { %v996_v28 = vpop.permute.xlu1 %995 }
 0x4ed   :  { %v2022_v19 = vpop.eup %2021 }
 0x4ee   :  { %v829_v20 = vsel %vm340_vm2, %v2022_v19, 0.0  ;;  %v1074_v32 = vpop.permute.xlu1 %1073 }
 0x4ef   :  { %830 = vadd.xlane.f32.xlu0 %v829_v20 }
 0x4f1   :  { %v2024_v22 = vpop.eup %2023 }
 0x4f2   :  { %v832_v25 = vsel %vm340_vm2, %v2024_v22, 0.0  ;;  %v1072_v35 = vpop.permute.xlu1 %1071 }
 0x4f3   :  { %833 = vadd.xlane.f32.xlu0 %v832_v25 }
 0x509   :  { %993 = vrot.lane.b32.xlu0 %v2457_v23, %s2243_s2 }
 0x57c   :  { %v831_v26 = vpop.xlane.xlu0 %830 }
 0x57d   :  { %2025 = vrcp.f32 %v831_v26 }
 0x580   :  { %v834_v27 = vpop.xlane.xlu0 %833 }
 0x581   :  { %2027 = vrcp.f32 %v834_v27 }
 0x584   :  { %v994_v34 = vpop.permute.xlu0 %993 }
 0x587   :  { %v2026_v29 = vpop.eup %2025 }
 0x588   :  { %v837_v30 = vmul.f32 %v2026_v29, %v2022_v19 }
 0x58a   :  { %1916 = vmatmul.mubr.msk.f32.vlgmr.msra.gmra.mrb[8].mxu0 %vm340_vm2, %v837_v30 }
 0x58b   :  { %v2028_v31 = vpop.eup %2027  ;;  %1924 = vmatpush3.xpose.msk.msra.mxu0 %vm340_vm2, %v996_v28  ;;  %1925 = vmatprep.mubr.msk.f32.mxu0 %vm2241_vm0, %v2240_v0 }
 0x58c   :  { %v838_v33 = vmul.f32 %v2028_v31, %v2024_v22  ;;  %1933 = vmatprep.subr.mxu0 %v2240_v0 }
 0x58e   :  { %1921 = vmatmul.mubr.msk.f32.vlgmr.msra.gmra.mrb[16].mxu1 %vm340_vm2, %v838_v33  ;;  %1926 = vmatmul.mubr.msk.f32.vlgmr.msra.gmra.mrb[10].mxu0 %vm340_vm2, %v994_v34 }
 0x58f   :  { %1929 = vmatpush3.xpose.msk.msra.mxu1 %vm340_vm2, %v1074_v32  ;;  %1930 = vmatprep.mubr.msk.f32.mxu1 %vm2241_vm0, %v2240_v0 }
 0x590   :  { %1938 = vmatprep.subr.mxu1 %v2240_v0  ;;  %1935 = vmatprep.mubr.msk.f32.mxu0 %vm2241_vm0, %v2240_v0 }
 0x592   :  { %1931 = vmatmul.mubr.msk.f32.vlgmr.msra.gmra.mrb[18].mxu1 %vm340_vm2, %v1072_v35 }
 0x593   :  { %1940 = vmatprep.mubr.msk.f32.mxu1 %vm2241_vm0, %v2240_v0 }
 0x65d   :  { %v2558_v36 = vpop.f32.mrb[8].mxu0 }
 0x65e   :  { %v1917_v37 = vpop.f32.mrb[9].mxu0 }
 0x661   :  { %v2560_v38 = vpop.f32.mrb[16].mxu1  ;;  %v1067_v39 = vpop.f32.mrb[10].mxu0 }
 0x662   :  { %v1990_v40 = vpack.i.bf16 %v2560_v38, %v2558_v36  ;;  %v1922_v41 = vpop.f32.mrb[17].mxu1  ;;  %v1927_v42 = vpop.f32.mrb[11].mxu0  ;;  %v1149_v43 = vsel %vm340_vm2, %v1067_v39, -inf  ;;  %v2012_v38 = vld [vmem:[#allocation11 + $0x8] sm:$0xff]  }
 0x663   :  { %1150 = vmax.xlane.f32.xlu0 %v1149_v43 }
 0x665   :  { %v1145_v44 = vpop.f32.mrb[18].mxu1 }
 0x666   :  { %v1932_v45 = vpop.f32.mrb[19].mxu1  ;;  %v1152_v46 = vsel %vm340_vm2, %v1145_v44, -inf }
 0x667   :  { %1153 = vmax.xlane.f32.xlu1 %v1152_v46 }
 0x678   :  { %1247 = vrot.lane.b32.xlu1 %v2496_v52, %s2243_s2 }
 0x679   :  { %1171 = vrot.lane.b32.xlu0 %v2494_v50, %s2243_s2 }
 0x67c   :  { %1325 = vrot.lane.b32.xlu1 %v2451_v18, %s2244_s13 }
 0x680   :  { %1403 = vrot.lane.b32.xlu1 %v2453_v21, %s2244_s13 }
 0x684   :  { %1401 = vrot.lane.b32.xlu1 %v2468_v24, %s2244_s13 }
 0x6f0   :  { %v1151_v47 = vpop.xlane.xlu0 %1150 }
 0x6f1   :  { %v1155_v48 = vsub.f32 %v1067_v39, %v1151_v47 }
 0x6f3   :  { %v1157_v49 = vmul.f32 1.442695, %v1155_v48 }
 0x6f4   :  { %v1172_v51 = vpop.permute.xlu0 %1171  ;;  %v1154_v53 = vpop.xlane.xlu1 %1153 }
 0x6f5   :  { %2029 = vpow2.f32 %v1157_v49  ;;  %v1156_v54 = vsub.f32 %v1145_v44, %v1154_v53  ;;  %1934 = vmatpush3.msra.mxu0 %v1172_v51 }
 0x6f6   :  { %1943 = vmatprep.subr.mxu0 %v2240_v0 }
 0x6f7   :  { %v1159_v55 = vmul.f32 1.442695, %v1156_v54 }
 0x6f8   :  { %v1248_v56 = vpop.permute.xlu1 %1247 }
 0x6f9   :  { %2031 = vpow2.f32 %v1159_v55  ;;  %1939 = vmatpush3.msra.mxu1 %v1248_v56 }
 0x6fa   :  { %1948 = vmatprep.subr.mxu1 %v2240_v0 }
 0x6fc   :  { %v1326_v60 = vpop.permute.xlu1 %1325 }
 0x6ff   :  { %v2030_v18 = vpop.eup %2029 }
 0x700   :  { %v1161_v21 = vsel %vm340_vm2, %v2030_v18, 0.0  ;;  %v1404_v3 = vpop.permute.xlu1 %1403 }
 0x701   :  { %1162 = vadd.xlane.f32.xlu0 %v1161_v21 }
 0x703   :  { %v2032_v24 = vpop.eup %2031 }
 0x704   :  { %v1164_v57 = vsel %vm340_vm2, %v2032_v24, 0.0  ;;  %v1402_v5 = vpop.permute.xlu1 %1401 }
 0x705   :  { %1165 = vadd.xlane.f32.xlu0 %v1164_v57 }
 0x71b   :  { %1323 = vrot.lane.b32.xlu0 %v2457_v23, %s2244_s13 }
 0x78e   :  { %v1163_v58 = vpop.xlane.xlu0 %1162 }
 0x78f   :  { %2033 = vrcp.f32 %v1163_v58  ;;  %v1811_v58 = vld [vmem:[#allocation13] ss:$0 sm:$0xff] }
 0x792   :  { %v1166_v59 = vpop.xlane.xlu0 %1165 }
 0x793   :  { %2035 = vrcp.f32 %v1166_v59 }
 0x796   :  { %v1324_v23 = vpop.permute.xlu0 %1323 }
 0x799   :  { %v2034_v61 = vpop.eup %2033 }
 0x79a   :  { %v1169_v62 = vmul.f32 %v2034_v61, %v2030_v18 }
 0x79c   :  { %1936 = vmatmul.mubr.msk.f32.vlgmr.msra.gmra.mrb[12].mxu0 %vm340_vm2, %v1169_v62 }
 0x79d   :  { %v2036_v1 = vpop.eup %2035  ;;  %1944 = vmatpush3.xpose.msk.msra.mxu0 %vm340_vm2, %v1326_v60  ;;  %1945 = vmatprep.mubr.msk.f32.mxu0 %vm2241_vm0, %v2240_v0 }
 0x79e   :  { %v1170_v4 = vmul.f32 %v2036_v1, %v2032_v24  ;;  %1953 = vmatprep.subr.mxu0 %v2240_v0 }
 0x7a0   :  { %1941 = vmatmul.mubr.msk.f32.vlgmr.msra.gmra.mrb[20].mxu1 %vm340_vm2, %v1170_v4  ;;  %1946 = vmatmul.mubr.msk.f32.vlgmr.msra.gmra.mrb[14].mxu0 %vm340_vm2, %v1324_v23 }
 0x7a1   :  { %1949 = vmatpush3.xpose.msk.msra.mxu1 %vm340_vm2, %v1404_v3  ;;  %1950 = vmatprep.mubr.msk.f32.mxu1 %vm2241_vm0, %v2240_v0 }
 0x7a2   :  { %1958 = vmatprep.subr.mxu1 %v2240_v0  ;;  %1955 = vmatprep.mubr.msk.f32.mxu0 %vm2241_vm0, %v2240_v0 }
 0x7a4   :  { %1951 = vmatmul.mubr.msk.f32.vlgmr.msra.gmra.mrb[22].mxu1 %vm340_vm2, %v1402_v5 }
 0x7a5   :  { %1960 = vmatprep.mubr.msk.f32.mxu1 %vm2241_vm0, %v2240_v0 }
 0x86f   :  { %v1243_v6 = vpop.f32.mrb[12].mxu0 }
 0x870   :  { %v1937_v7 = vpop.f32.mrb[13].mxu0 }
 0x873   :  { %v1319_v8 = vpop.f32.mrb[20].mxu1  ;;  %v1397_v9 = vpop.f32.mrb[14].mxu0 }
 0x874   :  { %v1995_v10 = vpack.i.bf16 %v1319_v8, %v1243_v6  ;;  %v1942_v11 = vpop.f32.mrb[21].mxu1  ;;  %v1947_v12 = vpop.f32.mrb[15].mxu0  ;;  %v1479_v13 = vsel %vm340_vm2, %v1397_v9, -inf }
 0x875   :  { %1480 = vmax.xlane.f32.xlu0 %v1479_v13 }
 0x877   :  { %v1475_v14 = vpop.f32.mrb[22].mxu1 }
 0x878   :  { %v1952_v15 = vpop.f32.mrb[23].mxu1  ;;  %v1482_v16 = vsel %vm340_vm2, %v1475_v14, -inf }
 0x879   :  { %1483 = vmax.xlane.f32.xlu1 %v1482_v16 }
 0x88a   :  { %1577 = vrot.lane.b32.xlu1 %v2496_v52, %s2244_s13 }
 0x88e   :  { %1991 = vrot.lane.b32.xlu1 %v1990_v40, %s2245_s14 }
 0x892   :  { %1996 = vrot.lane.b32.xlu1 %v1995_v10, %s2246_s16 }
 0x902   :  { %v1481_v17 = vpop.xlane.xlu0 %1480 }
 0x903   :  { %v1485_v19 = vsub.f32 %v1397_v9, %v1481_v17 }
 0x905   :  { %v1487_v20 = vmul.f32 1.442695, %v1485_v19 }
 0x906   :  { %v1484_v22 = vpop.xlane.xlu1 %1483 }
 0x907   :  { %2037 = vpow2.f32 %v1487_v20  ;;  %v1486_v25 = vsub.f32 %v1475_v14, %v1484_v22 }
 0x909   :  { %v1489_v26 = vmul.f32 1.442695, %v1486_v25 }
 0x90a   :  { %v1578_v27 = vpop.permute.xlu1 %1577 }
 0x90b   :  { %2039 = vpow2.f32 %v1489_v26  ;;  %1959 = vmatpush3.msra.mxu1 %v1578_v27 }
 0x90e   :  { %v1992_v44 = vpop.permute.xlu1 %1991 }
 0x90f   :  { %v1994_v46 = vunpack.i.h.bf16 %v1992_v44  ;;  %v1993_v47 = vunpack.i.l.bf16 %v1992_v44 }
 0x911   :  { %v2038_v28 = vpop.eup %2037  ;;  %v1677_v53 = vsel %vm340_vm2, %v2520_v63, %v1993_v47 }
 0x912   :  { %v1491_v52 = vsel %vm340_vm2, %v2038_v28, 0.0  ;;  %v1997_v45 = vpop.permute.xlu1 %1996 }
 0x913   :  { %1492 = vadd.xlane.f32.xlu0 %v1491_v52  ;;  %v1999_v48 = vunpack.i.h.bf16 %v1997_v45  ;;  %v1998_v49 = vunpack.i.l.bf16 %v1997_v45 }
 0x915   :  { %v2040_v29 = vpop.eup %2039  ;;  %v1680_v56 = vsel %vm1679_vm3, %v1677_v53, %v1998_v49 }
 0x916   :  { %v1494_v30 = vsel %vm340_vm2, %v2040_v29, 0.0 }
 0x917   :  { %1495 = vadd.xlane.f32.xlu0 %v1494_v30 }
 0x92d   :  { %1501 = vrot.lane.b32.xlu0 %v2494_v50, %s2244_s13  ;;  %v2011_v50 = vld [vmem:[#allocation11] sm:$0xff]  }
 0x9a0   :  { %v1493_v31 = vpop.xlane.xlu0 %1492 }
 0x9a1   :  { %2041 = vrcp.f32 %v1493_v31 }
 0x9a4   :  { %v1496_v32 = vpop.xlane.xlu0 %1495 }
 0x9a5   :  { %2043 = vrcp.f32 %v1496_v32 }
 0x9a8   :  { %v1502_v33 = vpop.permute.xlu0 %1501 }
 0x9a9   :  { %1954 = vmatpush3.msra.mxu0 %v1502_v33 }
 0x9aa   :  { %1963 = vmatprep.subr.bf16.mxu0 %v2240_v0 }
 0x9ab   :  { %v2042_v34 = vpop.eup %2041 }
 0x9ac   :  { %v1499_v35 = vmul.f32 %v2042_v34, %v2038_v28 }
 0x9ae   :  { %1956 = vmatmul.mubr.msk.f32.vlgmr.msra.gmra.mrb[16].mxu0 %vm340_vm2, %v1499_v35 }
 0x9af   :  { %v2044_v36 = vpop.eup %2043  ;;  %1967 = vmatprep.mubr.msk.bf16.mxu0 %vm2241_vm0, %v2240_v0  ;;  %1964 = vmatpush3.bf16.msra.mxu0 %v2011_v50 }
 0x9b0   :  { %v1500_v37 = vmul.f32 %v2044_v36, %v2040_v29  ;;  %1965 = vmatprep.subr.bf16.mxu0 %v2240_v0  ;;  %v1678_v0 = vsel %vm340_vm2, %v2522_v2, %v1994_v46 }
 0x9b1   :  { %v1681_v18 = vsel %vm1679_vm3, %v1678_v0, %v1999_v48 }
 0x9b2   :  { %1961 = vmatmul.mubr.msk.f32.vlgmr.msra.gmra.mrb[24].mxu1 %vm340_vm2, %v1500_v37 }
 0x9b3   :  { %1966 = vmatpush3.bf16.msra.mxu0 %v2012_v38 }
 0xa81   :  { %v1573_v39 = vpop.f32.mrb[16].mxu0 }
 0xa82   :  { %v1957_v40 = vpop.f32.mrb[17].mxu0 }
 0xa85   :  { %v1649_v41 = vpop.f32.mrb[24].mxu1 }
 0xa86   :  { %v2000_v42 = vpack.i.bf16 %v1649_v41, %v1573_v39  ;;  %v1962_v43 = vpop.f32.mrb[25].mxu1 }
 0xa88   :  { %2001 = vrot.lane.b32.xlu0 %v2000_v42, %s2247_s17 }
 0xafa   :  { %v2002_v51 = vpop.permute.xlu0 %2001 }
 0xafb   :  { %v2004_v54 = vunpack.i.h.bf16 %v2002_v51  ;;  %v2003_v55 = vunpack.i.l.bf16 %v2002_v51 }
 0xafd   :  { %v1684_v21 = vsel %vm1682_vm4, %v1681_v18, %v2004_v54  ;;  %v1683_v24 = vsel %vm1682_vm4, %v1680_v56, %v2003_v55 }
 0xafe   :  { %v1685_v57 = vpack.c.bf16 %v1684_v21, %v1683_v24 }
 0xb00   :  { %1968 = vmatmul.mubr.msk.bf16.vlgmr.msra.gmra.mrb[20].mxu0 %vm155_vm1, %v1685_v57 }
 0xbd3   :  { %v1746_v59 = vpop.f32.mrb[20].mxu0 }
 0xbd4   :  { %v1747_v60 = vadd.f32 %v1811_v58, %v1746_v59  ;;  %v1969_v61 = vpop.f32.mrb[21].mxu0 }
 0xbd5   :  { %v1749_v62 = vpop.f32.mrb[22].mxu0 }
 0xbd6   :  { %1753 = vst.msk [vmem:[#allocation14] sm:$0xff] %vm155_vm1, %v1747_v60  ;;  %v1750_v2 = vadd.f32 %v1811_v58, %v1749_v62  ;;  %v1970_v63 = vpop.f32.mrb[23].mxu0 }
 0xbd8   :  { %1754 = vst.msk [vmem:[#allocation14 + $0x8] sm:$0xff] %vm155_vm1, %v1750_v2 }
 0xbd9   :  { %2210 = shalt.err (!%p2207_p4)
}
 0xbda   :  { %s2211_s3 = scalar_lea.hbm %s2647_s11, 256 }
 0xbdb   :  { %p2212_p5 = scmp.ne.s32.totalorder %s2647_s11, %s2211_s3  ;;  %p2215_p6 = scmp.lt.u32.totalorder %s2211_s3, %s2647_s11 }
 0xbdd   :  { %p2217_p7 = pnand %p2215_p6, %p2212_p5 }
 0xbdf   :  { %2220 = shalt.err (!%p2217_p7)
}
 0xbe0   :  { %s2249_s10 = smov 128  }
 0xbe1   :  { %1766 = dma.vmem_to_hbm [thread:$0]  %s1761_s20, 256, %s2647_s11, [#allocation4], %s2249_s10, %s2249_s10, %s2245_s14  }
 0xbe2   :  { %2229 = dma.done.wait [#allocation4], 256  }
 0xbe3   :  { %2230 = vsyncadd [#allocation4], 4294967040 }
 0xbe4   :  { %1770 = vsyncpa [#allocation3], 1 }
 0xbe5   :  { %1771 = vsyncpa [#allocation6], 1 }
 0xbe6   :  { %1772 = vsyncpa [#allocation9], 1 }
 0xbe7   :  { %1773 = vsyncpa [#allocation12], 1 }
 0xbe8   :  { %1774 = vsyncpa [#allocation4], 1 }

</bundles_post_ra>
